<compile_context>
chip_gen: v6e
topology: v6e:2x2x1
jax: 0.10.0
libtpu: 0.0.40
codegen_flags: <defaults>
</compile_context>

<pallas_src>
import functools

import numpy as np

import jax
import jax.numpy as jnp
from jax.experimental import pallas as pl
from jax.experimental.pallas import tpu as pltpu

EPS = 1e-5


def _pick_row_tile(m, max_tile=256):
    """Largest multiple-of-8 divisor of m, capped at max_tile (fallback: m)."""
    for tm in (512, 256, 128, 64, 32, 16, 8):
        if tm <= max_tile and m % tm == 0:
            return tm
    return m


def _mosaic_params(semantics, est_bytes):
    # Scoped-VMEM request sized from the actual footprint, clamped to a range
    # legal on v5e (16 MiB default / 128 MiB phys) and v7x (32 / 64 MiB).
    limit = int(min(32 * 1024 * 1024, max(4 * 1024 * 1024, 2 * est_bytes)))
    return pltpu.CompilerParams(dimension_semantics=semantics,
                                vmem_limit_bytes=limit)


# ----------------------- kernel 1: BN batch statistics --------------------- #
def _bn_stats_kernel(x_ref, g_ref, b_ref, scale_ref, shift_ref, *, m_total):
    """Accumulate sum / sum(x*x) over row tiles; finalize to (scale, shift).

    scale_ref / shift_ref use a constant index_map, so they stay resident in
    VMEM across the whole grid and double as the accumulators (no scratch).
    """
    t = pl.program_id(0)

    @pl.when(t == 0)
    def _init():
        scale_ref[...] = jnp.zeros_like(scale_ref)
        shift_ref[...] = jnp.zeros_like(shift_ref)

    x = x_ref[...].astype(jnp.float32)
    scale_ref[...] += jnp.sum(x, axis=0, keepdims=True)       # running sum(x)
    shift_ref[...] += jnp.sum(x * x, axis=0, keepdims=True)   # running sum(x*x)

    @pl.when(t == pl.num_programs(0) - 1)
    def _finalize():
        inv_m = jnp.float32(1.0 / m_total)
        mean = scale_ref[...] * inv_m
        var = shift_ref[...] * inv_m - mean * mean             # biased variance
        scale = g_ref[...] * jax.lax.rsqrt(var + EPS)
        scale_ref[...] = scale
        shift_ref[...] = b_ref[...] - mean * scale


def _bn_scale_shift(xm, gamma2d, beta2d):
    m, d4 = xm.shape
    tm = _pick_row_tile(m)
    est = 2 * tm * d4 * 4 + 6 * d4 * 4
    return pl.pallas_call(
        functools.partial(_bn_stats_kernel, m_total=m),
        out_shape=(jax.ShapeDtypeStruct((1, d4), jnp.float32),
                   jax.ShapeDtypeStruct((1, d4), jnp.float32)),
        grid=(m // tm,),
        in_specs=[pl.BlockSpec((tm, d4), lambda t: (t, 0)),
                  pl.BlockSpec((1, d4), lambda t: (0, 0)),
                  pl.BlockSpec((1, d4), lambda t: (0, 0))],
        out_specs=(pl.BlockSpec((1, d4), lambda t: (0, 0)),
                   pl.BlockSpec((1, d4), lambda t: (0, 0))),
        compiler_params=_mosaic_params(("arbitrary",), est),
    )(xm, gamma2d, beta2d)


# --------------- kernel 2: normalize + reduction (Linear 4C->2C) ----------- #
def _apply_kernel(x_ref, scale_ref, shift_ref, w_ref, o_ref, *, matmul_dtype):
    x = x_ref[...].astype(jnp.float32)
    xn = x * scale_ref[...] + shift_ref[...]                   # fused BN affine
    # One big (TM, 4C) x (4C, 2C) MXU matmul per tile (no per-batch loops).
    o_ref[...] = jnp.dot(xn.astype(matmul_dtype),
                         w_ref[...].astype(matmul_dtype),
                         preferred_element_type=jnp.float32).astype(o_ref.dtype)


def _bn_apply_reduction(xm, scale, shift, w_t, out_dtype, matmul_dtype):
    m, d4 = xm.shape
    d2 = w_t.shape[1]
    tm = _pick_row_tile(m)
    est = 2 * (tm * d4 * 4 + tm * d2 * 4) + d4 * d2 * 4 + 4 * d4 * 4
    return pl.pallas_call(
        functools.partial(_apply_kernel, matmul_dtype=matmul_dtype),
        out_shape=jax.ShapeDtypeStruct((m, d2), out_dtype),
        grid=(m // tm,),
        in_specs=[pl.BlockSpec((tm, d4), lambda t: (t, 0)),
                  pl.BlockSpec((1, d4), lambda t: (0, 0)),
                  pl.BlockSpec((1, d4), lambda t: (0, 0)),
                  pl.BlockSpec((d4, d2), lambda t: (0, 0))],
        out_specs=pl.BlockSpec((tm, d2), lambda t: (t, 0)),
        compiler_params=_mosaic_params(("parallel",), est),
    )(xm, scale, shift, w_t)


# ------------------------------- wrapper ----------------------------------- #
@functools.partial(jax.jit, static_argnames=("input_length", "matmul_dtype"))
def patch_merging_forward(x, gamma, beta, w_t, *, input_length,
                          matmul_dtype=jnp.float32):
    """PatchMerging forward.  x: (B, H*W, C) -> (B, H/2*W/2, 2C).

    w_t is reduction.weight.T with shape (4C, 2C).  Set
    matmul_dtype=jnp.bfloat16 on v6e/v7x for ~2x MXU throughput (at ~1e-3 abs
    error vs the f32 reference); f32 default keeps exact module semantics.
    """
    b, l, c = x.shape
    h = w = int(np.sqrt(input_length))
    assert l == h * w, "input feature has wrong size"
    assert h % 2 == 0 and w % 2 == 0, f"x size ({h}*{w}) are not even."

    # 2x2 window merge == torch.cat([x0, x1, x2, x3], -1): pure layout, done
    # wrapper-side so the kernels get one lane-dense (M, 4C) slab.
    xw = x.reshape(b, h // 2, 2, w // 2, 2, c)           # (b, hh, hp, ww, wp, c)
    xm = jnp.transpose(xw, (0, 1, 3, 4, 2, 5)).reshape(  # (b, hh, ww, wp, hp, c)
        b * (h // 2) * (w // 2), 4 * c)                  # channel = wp*2C+hp*C+c

    gamma2d = gamma.reshape(1, 4 * c).astype(jnp.float32)
    beta2d = beta.reshape(1, 4 * c).astype(jnp.float32)

    scale, shift = _bn_scale_shift(xm, gamma2d, beta2d)
    out2d = _bn_apply_reduction(xm, scale, shift, w_t, x.dtype, matmul_dtype)
    return out2d.reshape(b, (h // 2) * (w // 2), 2 * c)


# --------------------------- plain-JAX reference --------------------------- #
def patch_merging_ref(x, gamma, beta, w_t, input_length):
    b, l, c = x.shape
    h = w = int(np.sqrt(input_length))
    xv = x.reshape(b, h, w, c)
    x0 = xv[:, 0::2, 0::2, :]
    x1 = xv[:, 1::2, 0::2, :]
    x2 = xv[:, 0::2, 1::2, :]
    x3 = xv[:, 1::2, 1::2, :]
    xm = jnp.concatenate([x0, x1, x2, x3], axis=-1).reshape(b, -1, 4 * c)
    mean = jnp.mean(xm, axis=(0, 1), keepdims=True)
    var = jnp.mean((xm - mean) ** 2, axis=(0, 1), keepdims=True)
    xn = (xm - mean) / jnp.sqrt(var + EPS) * gamma.reshape(1, 1, -1) \
         + beta.reshape(1, 1, -1)
    return jnp.einsum('bpd,de->bpe', xn, w_t)


if __name__ == "__main__":
    key = jax.random.PRNGKey(0)
    B, C = 2, 32
    H = W = 32
    input_length = H * W            # 1024 -> M = B*(H/2)*(W/2) = 512 merged rows
    kx, kg, kb, kw = jax.random.split(key, 4)
    x = jax.random.normal(kx, (B, H * W, C), jnp.float32)
    gamma = 1.0 + 0.05 * jax.random.normal(kg, (4 * C,), jnp.float32)
    beta = 0.05 * jax.random.normal(kb, (4 * C,), jnp.float32)
    w_t = 0.05 * jax.random.normal(kw, (4 * C, 2 * C), jnp.float32)  # weight.T

    out = patch_merging_forward(x, gamma, beta, w_t, input_length=input_length)
    out = jax.block_until_ready(out)

    ref = patch_merging_ref(x, gamma, beta, w_t, input_length)
    assert out.shape == (B, (H // 2) * (W // 2), 2 * C), out.shape
    max_err = float(jnp.max(jnp.abs(out - ref)))
    assert jnp.allclose(out, ref, atol=1e-4, rtol=1e-4), f"max_err={max_err}"
    print("KERNEL_OK")
</pallas_src>

<mosaic_0001>
module attributes {stable_mosaic.version = 11 : i64} {
  func.func @_bn_stats_kernel(%arg0: i32, %arg1: memref<256x128xf32, #tpu.memory_space<vmem>>, %arg2: memref<1x128xf32, #tpu.memory_space<vmem>>, %arg3: memref<1x128xf32, #tpu.memory_space<vmem>>, %arg4: memref<1x128xf32, #tpu.memory_space<vmem>>, %arg5: memref<1x128xf32, #tpu.memory_space<vmem>>) attributes {dimension_semantics = [#tpu.dimension_semantics<arbitrary>], iteration_bounds = array<i64: 2>, scalar_prefetch = 0 : i64, scratch_operands = 0 : i64, tpu.core_type = #tpu.core_type<tc>, window_params = [{transform_indices = @transform_0, window_bounds = array<i64: 256, 128>}, {pipeline_mode = #tpu.pipeline_mode<synchronous>, transform_indices = @transform_1, window_bounds = array<i64: 1, 128>}, {pipeline_mode = #tpu.pipeline_mode<synchronous>, transform_indices = @transform_2, window_bounds = array<i64: 1, 128>}, {pipeline_mode = #tpu.pipeline_mode<synchronous>, transform_indices = @transform_3, window_bounds = array<i64: 1, 128>}, {pipeline_mode = #tpu.pipeline_mode<synchronous>, transform_indices = @transform_4, window_bounds = array<i64: 1, 128>}]} {
    %c0_i32 = arith.constant 0 : i32
    %0 = arith.cmpi eq, %arg0, %c0_i32 : i32
    %1 = arith.extui %0 : i1 to i32
    %c0_i32_0 = arith.constant 0 : i32
    %2 = arith.cmpi ne, %1, %c0_i32_0 : i32
    scf.if %2 {
      %cst_12 = arith.constant 0.000000e+00 : f32
      %18 = vector.broadcast %cst_12 : f32 to vector<1x128xf32>
      %c0_13 = arith.constant 0 : index
      %c0_14 = arith.constant 0 : index
      %19 = vector.load %arg4[%c0_13, %c0_14] : memref<1x128xf32, #tpu.memory_space<vmem>>, vector<1x128xf32>
      tpu.vector_store %arg4[%c0_13, %c0_14], %18 {strides = array<i32>} : memref<1x128xf32, #tpu.memory_space<vmem>>, vector<1x128xf32>,
      %cst_15 = arith.constant 0.000000e+00 : f32
      %20 = vector.broadcast %cst_15 : f32 to vector<1x128xf32>
      %c0_16 = arith.constant 0 : index
      %c0_17 = arith.constant 0 : index
      %21 = vector.load %arg5[%c0_16, %c0_17] : memref<1x128xf32, #tpu.memory_space<vmem>>, vector<1x128xf32>
      tpu.vector_store %arg5[%c0_16, %c0_17], %20 {strides = array<i32>} : memref<1x128xf32, #tpu.memory_space<vmem>>, vector<1x128xf32>,
    } else {
    }
    %c0 = arith.constant 0 : index
    %c0_1 = arith.constant 0 : index
    %3 = vector.load %arg1[%c0, %c0_1] : memref<256x128xf32, #tpu.memory_space<vmem>>, vector<256x128xf32>
    %c0_2 = arith.constant 0 : index
    %c0_3 = arith.constant 0 : index
    %4 = vector.load %arg4[%c0_2, %c0_3] : memref<1x128xf32, #tpu.memory_space<vmem>>, vector<1x128xf32>
    %cst = arith.constant dense<0.000000e+00> : vector<128xf32>
    %5 = vector.multi_reduction <add>, %3, %cst [0] : vector<256x128xf32> to vector<128xf32>
    %6 = vector.shape_cast %5 : vector<128xf32> to vector<1x128xf32>
    %7 = arith.addf %4, %6 : vector<1x128xf32>
    %c0_4 = arith.constant 0 : index
    %c0_5 = arith.constant 0 : index
    %8 = vector.load %arg4[%c0_4, %c0_5] : memref<1x128xf32, #tpu.memory_space<vmem>>, vector<1x128xf32>
    tpu.vector_store %arg4[%c0_4, %c0_5], %7 {strides = array<i32>} : memref<1x128xf32, #tpu.memory_space<vmem>>, vector<1x128xf32>,
    %c0_6 = arith.constant 0 : index
    %c0_7 = arith.constant 0 : index
    %9 = vector.load %arg5[%c0_6, %c0_7] : memref<1x128xf32, #tpu.memory_space<vmem>>, vector<1x128xf32>
    %10 = arith.mulf %3, %3 : vector<256x128xf32>
    %cst_8 = arith.constant dense<0.000000e+00> : vector<128xf32>
    %11 = vector.multi_reduction <add>, %10, %cst_8 [0] : vector<256x128xf32> to vector<128xf32>
    %12 = vector.shape_cast %11 : vector<128xf32> to vector<1x128xf32>
    %13 = arith.addf %9, %12 : vector<1x128xf32>
    %c0_9 = arith.constant 0 : index
    %c0_10 = arith.constant 0 : index
    %14 = vector.load %arg5[%c0_9, %c0_10] : memref<1x128xf32, #tpu.memory_space<vmem>>, vector<1x128xf32>
    tpu.vector_store %arg5[%c0_9, %c0_10], %13 {strides = array<i32>} : memref<1x128xf32, #tpu.memory_space<vmem>>, vector<1x128xf32>,
    %c1_i32 = arith.constant 1 : i32
    %15 = arith.cmpi eq, %arg0, %c1_i32 : i32
    %16 = arith.extui %15 : i1 to i32
    %c0_i32_11 = arith.constant 0 : i32
    %17 = arith.cmpi ne, %16, %c0_i32_11 : i32
    scf.if %17 {
      %c0_12 = arith.constant 0 : index
      %c0_13 = arith.constant 0 : index
      %18 = vector.load %arg4[%c0_12, %c0_13] : memref<1x128xf32, #tpu.memory_space<vmem>>, vector<1x128xf32>
      %cst_14 = arith.constant 0.001953125 : f32
      %19 = vector.broadcast %cst_14 : f32 to vector<1x128xf32>
      %20 = arith.mulf %18, %19 : vector<1x128xf32>
      %c0_15 = arith.constant 0 : index
      %c0_16 = arith.constant 0 : index
      %21 = vector.load %arg5[%c0_15, %c0_16] : memref<1x128xf32, #tpu.memory_space<vmem>>, vector<1x128xf32>
      %cst_17 = arith.constant 0.001953125 : f32
      %22 = vector.broadcast %cst_17 : f32 to vector<1x128xf32>
      %23 = arith.mulf %21, %22 : vector<1x128xf32>
      %24 = arith.mulf %20, %20 : vector<1x128xf32>
      %25 = arith.subf %23, %24 : vector<1x128xf32>
      %c0_18 = arith.constant 0 : index
      %c0_19 = arith.constant 0 : index
      %26 = vector.load %arg2[%c0_18, %c0_19] : memref<1x128xf32, #tpu.memory_space<vmem>>, vector<1x128xf32>
      %cst_20 = arith.constant 9.99999974E-6 : f32
      %27 = vector.broadcast %cst_20 : f32 to vector<1x128xf32>
      %28 = arith.addf %25, %27 : vector<1x128xf32>
      %29 = math.rsqrt %28 : vector<1x128xf32>
      %30 = arith.mulf %26, %29 : vector<1x128xf32>
      %c0_21 = arith.constant 0 : index
      %c0_22 = arith.constant 0 : index
      %31 = vector.load %arg4[%c0_21, %c0_22] : memref<1x128xf32, #tpu.memory_space<vmem>>, vector<1x128xf32>
      tpu.vector_store %arg4[%c0_21, %c0_22], %30 {strides = array<i32>} : memref<1x128xf32, #tpu.memory_space<vmem>>, vector<1x128xf32>,
      %c0_23 = arith.constant 0 : index
      %c0_24 = arith.constant 0 : index
      %32 = vector.load %arg3[%c0_23, %c0_24] : memref<1x128xf32, #tpu.memory_space<vmem>>, vector<1x128xf32>
      %33 = arith.mulf %20, %30 : vector<1x128xf32>
      %34 = arith.subf %32, %33 : vector<1x128xf32>
      %c0_25 = arith.constant 0 : index
      %c0_26 = arith.constant 0 : index
      %35 = vector.load %arg5[%c0_25, %c0_26] : memref<1x128xf32, #tpu.memory_space<vmem>>, vector<1x128xf32>
      tpu.vector_store %arg5[%c0_25, %c0_26], %34 {strides = array<i32>} : memref<1x128xf32, #tpu.memory_space<vmem>>, vector<1x128xf32>,
    } else {
    }
    return
  }
  func.func @transform_0(%arg0: i32) -> (i32, i32) {
    %c0_i32 = arith.constant 0 : i32
    %c0_i32_0 = arith.constant 0 : i32
    return %arg0, %c0_i32 : i32, i32
  }
  func.func @transform_1(%arg0: i32) -> (i32, i32) {
    %c0_i32 = arith.constant 0 : i32
    %c0_i32_0 = arith.constant 0 : i32
    %c0_i32_1 = arith.constant 0 : i32
    return %c0_i32, %c0_i32_0 : i32, i32
  }
  func.func @transform_2(%arg0: i32) -> (i32, i32) {
    %c0_i32 = arith.constant 0 : i32
    %c0_i32_0 = arith.constant 0 : i32
    %c0_i32_1 = arith.constant 0 : i32
    return %c0_i32, %c0_i32_0 : i32, i32
  }
  func.func @transform_3(%arg0: i32) -> (i32, i32) {
    %c0_i32 = arith.constant 0 : i32
    %c0_i32_0 = arith.constant 0 : i32
    %c0_i32_1 = arith.constant 0 : i32
    return %c0_i32, %c0_i32_0 : i32, i32
  }
  func.func @transform_4(%arg0: i32) -> (i32, i32) {
    %c0_i32 = arith.constant 0 : i32
    %c0_i32_0 = arith.constant 0 : i32
    %c0_i32_1 = arith.constant 0 : i32
    return %c0_i32, %c0_i32_0 : i32, i32
  }
}

module attributes {stable_mosaic.version = 11 : i64} {
  func.func @_apply_kernel(%arg0: i32, %arg1: memref<256x128xf32, #tpu.memory_space<vmem>>, %arg2: memref<1x128xf32, #tpu.memory_space<vmem>>, %arg3: memref<1x128xf32, #tpu.memory_space<vmem>>, %arg4: memref<128x64xf32, #tpu.memory_space<vmem>>, %arg5: memref<256x64xf32, #tpu.memory_space<vmem>>) attributes {dimension_semantics = [#tpu.dimension_semantics<parallel>], iteration_bounds = array<i64: 2>, scalar_prefetch = 0 : i64, scratch_operands = 0 : i64, tpu.core_type = #tpu.core_type<tc>, window_params = [{transform_indices = @transform_0, window_bounds = array<i64: 256, 128>}, {pipeline_mode = #tpu.pipeline_mode<synchronous>, transform_indices = @transform_1, window_bounds = array<i64: 1, 128>}, {pipeline_mode = #tpu.pipeline_mode<synchronous>, transform_indices = @transform_2, window_bounds = array<i64: 1, 128>}, {pipeline_mode = #tpu.pipeline_mode<synchronous>, transform_indices = @transform_3, window_bounds = array<i64: 128, 64>}, {transform_indices = @transform_4, window_bounds = array<i64: 256, 64>}]} {
    %c0 = arith.constant 0 : index
    %c0_0 = arith.constant 0 : index
    %0 = vector.load %arg1[%c0, %c0_0] : memref<256x128xf32, #tpu.memory_space<vmem>>, vector<256x128xf32>
    %c0_1 = arith.constant 0 : index
    %c0_2 = arith.constant 0 : index
    %1 = vector.load %arg2[%c0_1, %c0_2] : memref<1x128xf32, #tpu.memory_space<vmem>>, vector<1x128xf32>
    %2 = vector.broadcast %1 : vector<1x128xf32> to vector<256x128xf32>
    %3 = arith.mulf %0, %2 : vector<256x128xf32>
    %c0_3 = arith.constant 0 : index
    %c0_4 = arith.constant 0 : index
    %4 = vector.load %arg3[%c0_3, %c0_4] : memref<1x128xf32, #tpu.memory_space<vmem>>, vector<1x128xf32>
    %5 = vector.broadcast %4 : vector<1x128xf32> to vector<256x128xf32>
    %6 = arith.addf %3, %5 : vector<256x128xf32>
    %c0_5 = arith.constant 0 : index
    %c0_6 = arith.constant 0 : index
    %7 = vector.load %arg4[%c0_5, %c0_6] : memref<128x64xf32, #tpu.memory_space<vmem>>, vector<128x64xf32>
    %cst = arith.constant dense<0.000000e+00> : vector<256x64xf32>
    %8 = tpu.matmul %6, %7, %cst {dimension_numbers = #tpu.dot_dimension_numbers<[1], [0], [0], [1], [0, 0, 1, 1], [], []>} : vector<256x128xf32>, vector<128x64xf32>, vector<256x64xf32> -> vector<256x64xf32>
    %c0_7 = arith.constant 0 : index
    %c0_8 = arith.constant 0 : index
    %9 = vector.load %arg5[%c0_7, %c0_8] : memref<256x64xf32, #tpu.memory_space<vmem>>, vector<256x64xf32>
    tpu.vector_store %arg5[%c0_7, %c0_8], %8 {strides = array<i32>} : memref<256x64xf32, #tpu.memory_space<vmem>>, vector<256x64xf32>,
    return
  }
  func.func @transform_0(%arg0: i32) -> (i32, i32) {
    %c0_i32 = arith.constant 0 : i32
    %c0_i32_0 = arith.constant 0 : i32
    return %arg0, %c0_i32 : i32, i32
  }
  func.func @transform_1(%arg0: i32) -> (i32, i32) {
    %c0_i32 = arith.constant 0 : i32
    %c0_i32_0 = arith.constant 0 : i32
    %c0_i32_1 = arith.constant 0 : i32
    return %c0_i32, %c0_i32_0 : i32, i32
  }
  func.func @transform_2(%arg0: i32) -> (i32, i32) {
    %c0_i32 = arith.constant 0 : i32
    %c0_i32_0 = arith.constant 0 : i32
    %c0_i32_1 = arith.constant 0 : i32
    return %c0_i32, %c0_i32_0 : i32, i32
  }
  func.func @transform_3(%arg0: i32) -> (i32, i32) {
    %c0_i32 = arith.constant 0 : i32
    %c0_i32_0 = arith.constant 0 : i32
    %c0_i32_1 = arith.constant 0 : i32
    return %c0_i32, %c0_i32_0 : i32, i32
  }
  func.func @transform_4(%arg0: i32) -> (i32, i32) {
    %c0_i32 = arith.constant 0 : i32
    %c0_i32_0 = arith.constant 0 : i32
    return %arg0, %c0_i32 : i32, i32
  }
}

</mosaic_0001>

<bundles_post_ra>
// kernel: patch_merging_forward.2
= control target key start
LH: loop header
LB: loop body
LE: loop exit
PB: predicated region body
PF: predicated region fallthrough
CT: control target
= control target key end

     0   :  { %s441_s15 = smov 0   ;;  %s530_s0 = inlined_call_operand.vmem [shape: f32[512,128], index: 0, kind: input, shape index: {}]   ;;  %s531_s1 = inlined_call_operand.vmem [shape: f32[1,128], index: 1, kind: input, shape index: {}]   ;;  %s532_s2 = inlined_call_operand.vmem [shape: f32[1,128], index: 2, kind: input, shape index: {}]   ;;  %s533_s3 = inlined_call_operand.vmem [shape: f32[1,128], index: 3, kind: output, shape index: {0}]   ;;  %s534_s4 = inlined_call_operand.vmem [shape: f32[1,128], index: 4, kind: output, shape index: {1}]  }
   0x1 LB: > { %s447_s16 = sadd.s32 4294967295, %s413_s15   ;;  %p389_p0 = scmp.ge.s32.totalorder %s413_s15, 1  ;;  %s413_s15 = sphi %s441_s15, %s15_s15  }
   0x2   : > { %p156_p1 = scmp.lt.s32.totalorder %s413_s15, 3 }
   0x4   : > { %p157_p2 = pnand %p389_p0, %p156_p1 }
   0x5   : > { %s390_s17 = sshll.u32 (!%p157_p2), %s447_s16, 5  ;;  %p392_p4 = scmp.ne.s32.totalorder (!%p157_p2), %s447_s16, 0 }
   0x6   : > { %160 = sbr.rel (%p157_p2) target bundleno = 132 (0x84), region = 32  ;;  %p178_p3 = scmp.lt.s32.totalorder (!%p157_p2), %s390_s17, 63 }
   0xb   : > { %s536_s17 = smov (!%p178_p3, %s390_s17), 63  ;;  %186 = sbr.rel (%p392_p4) target bundleno = 18 (0x12), region = 36 }
   0xc   : > { %s391_s18 = sshll.u32 %s536_s17, 3 }
   0xd   : > { %s455_s21 = scalar_lea.vmem %s530_s0, %s391_s18 }
  0x10   : > { %v415_v0 = vmov 0.0  }
  0x11   : > { %187 = vst [vmem:[%s533_s3] sm:$0x1] %v415_v0  ;;  %188 = vst [vmem:[%s534_s4] sm:$0x1] %v415_v0 }
  0x12 PF: > { %v189_v1 = vld [vmem:[%s455_s21] sm:$0xff]  ;;  %v190_v2 = vld [vmem:[%s455_s21 + $0x8] sm:$0xff]  ;;  %v191_v3 = vld [vmem:[%s455_s21 + $0x10] sm:$0xff]  ;;  %p393_p5 = scmp.ne.s32.totalorder %s447_s16, 1 }
  0x13   : > { %v192_v4 = vld [vmem:[%s455_s21 + $0x18] sm:$0xff]  ;;  %v222_v5 = vadd.f32 %v190_v2, %v189_v1  ;;  %v262_v6 = vmul.f32 %v189_v1, %v189_v1  ;;  %v263_v7 = vmul.f32 %v190_v2, %v190_v2  ;;  %v264_v8 = vmul.f32 %v191_v3, %v191_v3  ;;  %v193_v9 = vld [vmem:[%s455_s21 + $0x20] sm:$0xff]  ;;  %v194_v13 = vld [vmem:[%s455_s21 + $0x28] sm:$0xff] }
  0x14   : > { %v265_v11 = vmul.f32 %v192_v4, %v192_v4  ;;  %v266_v15 = vmul.f32 %v193_v9, %v193_v9  ;;  %v195_v17 = vld [vmem:[%s455_s21 + $0x30] sm:$0xff]  ;;  %v267_v19 = vmul.f32 %v194_v13, %v194_v13  ;;  %v196_v21 = vld [vmem:[%s455_s21 + $0x38] sm:$0xff]  ;;  %v197_v25 = vld [vmem:[%s455_s21 + $0x40] sm:$0xff] }
  0x15   : > { %v223_v10 = vadd.f32 %v222_v5, %v191_v3  ;;  %v294_v12 = vadd.f32 %v263_v7, %v262_v6  ;;  %v268_v23 = vmul.f32 %v195_v17, %v195_v17  ;;  %v269_v27 = vmul.f32 %v196_v21, %v196_v21  ;;  %v198_v29 = vld [vmem:[%s455_s21 + $0x48] sm:$0xff]  ;;  %v199_v33 = vld [vmem:[%s455_s21 + $0x50] sm:$0xff]  ;;  %v200_v37 = vld [vmem:[%s455_s21 + $0x58] sm:$0xff] }
  0x16   : > { %v270_v31 = vmul.f32 %v197_v25, %v197_v25  ;;  %v271_v35 = vmul.f32 %v198_v29, %v198_v29  ;;  %v272_v39 = vmul.f32 %v199_v33, %v199_v33  ;;  %v201_v41 = vld [vmem:[%s455_s21 + $0x60] sm:$0xff]  ;;  %v273_v43 = vmul.f32 %v200_v37, %v200_v37  ;;  %v202_v45 = vld [vmem:[%s455_s21 + $0x68] sm:$0xff]  ;;  %v203_v49 = vld [vmem:[%s455_s21 + $0x70] sm:$0xff] }
  0x17   : > { %v224_v14 = vadd.f32 %v223_v10, %v192_v4  ;;  %v295_v16 = vadd.f32 %v294_v12, %v264_v8  ;;  %v274_v47 = vmul.f32 %v201_v41, %v201_v41  ;;  %v275_v51 = vmul.f32 %v202_v45, %v202_v45  ;;  %v204_v53 = vld [vmem:[%s455_s21 + $0x78] sm:$0xff]  ;;  %v205_v57 = vld [vmem:[%s455_s21 + $0x80] sm:$0xff]  ;;  %v206_v61 = vld [vmem:[%s455_s21 + $0x88] sm:$0xff] }
  0x18   : > { %v276_v55 = vmul.f32 %v203_v49, %v203_v49  ;;  %v277_v59 = vmul.f32 %v204_v53, %v204_v53  ;;  %v278_v63 = vmul.f32 %v205_v57, %v205_v57  ;;  %v207_v1 = vld [vmem:[%s455_s21 + $0x90] sm:$0xff]  ;;  %v279_v3 = vmul.f32 %v206_v61, %v206_v61  ;;  %v208_v5 = vld [vmem:[%s455_s21 + $0x98] sm:$0xff] }
  0x19   : > { %v225_v18 = vadd.f32 %v224_v14, %v193_v9  ;;  %v296_v20 = vadd.f32 %v295_v16, %v265_v11  ;;  %v280_v7 = vmul.f32 %v207_v1, %v207_v1  ;;  %v209_v9 = vld [vmem:[%s455_s21 + $0xa0] sm:$0xff]  ;;  %v281_v11 = vmul.f32 %v208_v5, %v208_v5 }
  0x1b   : > { %v226_v22 = vadd.f32 %v225_v18, %v194_v13  ;;  %v297_v24 = vadd.f32 %v296_v20, %v266_v15  ;;  %v210_v13 = vld [vmem:[%s455_s21 + $0xa8] sm:$0xff]  ;;  %v282_v15 = vmul.f32 %v209_v9, %v209_v9 }
  0x1d   : > { %v227_v26 = vadd.f32 %v226_v22, %v195_v17  ;;  %v298_v28 = vadd.f32 %v297_v24, %v267_v19  ;;  %v211_v17 = vld [vmem:[%s455_s21 + $0xb0] sm:$0xff]  ;;  %v283_v19 = vmul.f32 %v210_v13, %v210_v13 }
  0x1f   : > { %v228_v30 = vadd.f32 %v227_v26, %v196_v21  ;;  %v299_v32 = vadd.f32 %v298_v28, %v268_v23  ;;  %v212_v21 = vld [vmem:[%s455_s21 + $0xb8] sm:$0xff]  ;;  %v284_v23 = vmul.f32 %v211_v17, %v211_v17 }
  0x21   : > { %v229_v34 = vadd.f32 %v228_v30, %v197_v25  ;;  %v300_v36 = vadd.f32 %v299_v32, %v269_v27  ;;  %v213_v25 = vld [vmem:[%s455_s21 + $0xc0] sm:$0xff]  ;;  %v285_v27 = vmul.f32 %v212_v21, %v212_v21 }
  0x23   : > { %v230_v38 = vadd.f32 %v229_v34, %v198_v29  ;;  %v301_v40 = vadd.f32 %v300_v36, %v270_v31  ;;  %v214_v29 = vld [vmem:[%s455_s21 + $0xc8] sm:$0xff]  ;;  %v286_v31 = vmul.f32 %v213_v25, %v213_v25 }
  0x25   : > { %v231_v42 = vadd.f32 %v230_v38, %v199_v33  ;;  %v302_v44 = vadd.f32 %v301_v40, %v271_v35  ;;  %v215_v33 = vld [vmem:[%s455_s21 + $0xd0] sm:$0xff]  ;;  %v287_v35 = vmul.f32 %v214_v29, %v214_v29 }
  0x27   : > { %v232_v46 = vadd.f32 %v231_v42, %v200_v37  ;;  %v303_v48 = vadd.f32 %v302_v44, %v272_v39  ;;  %v216_v37 = vld [vmem:[%s455_s21 + $0xd8] sm:$0xff]  ;;  %v288_v39 = vmul.f32 %v215_v33, %v215_v33 }
  0x29   : > { %v233_v50 = vadd.f32 %v232_v46, %v201_v41  ;;  %v304_v52 = vadd.f32 %v303_v48, %v273_v43  ;;  %v217_v41 = vld [vmem:[%s455_s21 + $0xe0] sm:$0xff]  ;;  %v289_v43 = vmul.f32 %v216_v37, %v216_v37 }
  0x2b   : > { %v234_v54 = vadd.f32 %v233_v50, %v202_v45  ;;  %v305_v56 = vadd.f32 %v304_v52, %v274_v47  ;;  %v218_v45 = vld [vmem:[%s455_s21 + $0xe8] sm:$0xff]  ;;  %v290_v47 = vmul.f32 %v217_v41, %v217_v41 }
  0x2d   : > { %v235_v58 = vadd.f32 %v234_v54, %v203_v49  ;;  %v306_v60 = vadd.f32 %v305_v56, %v275_v51  ;;  %v219_v49 = vld [vmem:[%s455_s21 + $0xf0] sm:$0xff]  ;;  %v291_v51 = vmul.f32 %v218_v45, %v218_v45 }
  0x2f   : > { %v236_v62 = vadd.f32 %v235_v58, %v204_v53  ;;  %v307_v0 = vadd.f32 %v306_v60, %v276_v55  ;;  %v220_v53 = vld [vmem:[%s455_s21 + $0xf8] sm:$0xff]  ;;  %v292_v55 = vmul.f32 %v219_v49, %v219_v49 }
  0x30   : > { %v293_v58 = vmul.f32 %v220_v53, %v220_v53 }
  0x31   : > { %v237_v2 = vadd.f32 %v236_v62, %v205_v57  ;;  %v308_v4 = vadd.f32 %v307_v0, %v277_v59 }
  0x33   : > { %v238_v6 = vadd.f32 %v237_v2, %v206_v61  ;;  %v309_v8 = vadd.f32 %v308_v4, %v278_v63 }
  0x35   : > { %v239_v10 = vadd.f32 %v238_v6, %v207_v1  ;;  %v310_v12 = vadd.f32 %v309_v8, %v279_v3 }
  0x37   : > { %v240_v14 = vadd.f32 %v239_v10, %v208_v5  ;;  %v311_v16 = vadd.f32 %v310_v12, %v280_v7  ;;  %v221_v7 = vld [vmem:[%s533_s3] sm:$0x1] }
  0x38   : > { %v261_v12 = vld [vmem:[%s534_s4] sm:$0x1] }
  0x39   : > { %v241_v18 = vadd.f32 %v240_v14, %v209_v9  ;;  %v312_v20 = vadd.f32 %v311_v16, %v281_v11 }
  0x3b   : > { %v242_v22 = vadd.f32 %v241_v18, %v210_v13  ;;  %v313_v24 = vadd.f32 %v312_v20, %v282_v15 }
  0x3d   : > { %v243_v26 = vadd.f32 %v242_v22, %v211_v17  ;;  %v314_v28 = vadd.f32 %v313_v24, %v283_v19 }
  0x3f   : > { %v244_v30 = vadd.f32 %v243_v26, %v212_v21  ;;  %v315_v32 = vadd.f32 %v314_v28, %v284_v23 }
  0x41   : > { %v245_v34 = vadd.f32 %v244_v30, %v213_v25  ;;  %v316_v36 = vadd.f32 %v315_v32, %v285_v27 }
  0x43   : > { %v246_v38 = vadd.f32 %v245_v34, %v214_v29  ;;  %v317_v40 = vadd.f32 %v316_v36, %v286_v31 }
  0x45   : > { %v247_v42 = vadd.f32 %v246_v38, %v215_v33  ;;  %v318_v44 = vadd.f32 %v317_v40, %v287_v35 }
  0x47   : > { %v248_v46 = vadd.f32 %v247_v42, %v216_v37  ;;  %v319_v48 = vadd.f32 %v318_v44, %v288_v39 }
  0x49   : > { %v249_v50 = vadd.f32 %v248_v46, %v217_v41  ;;  %v320_v52 = vadd.f32 %v319_v48, %v289_v43 }
  0x4b   : > { %v250_v54 = vadd.f32 %v249_v50, %v218_v45  ;;  %v321_v56 = vadd.f32 %v320_v52, %v290_v47 }
  0x4d   : > { %v251_v57 = vadd.f32 %v250_v54, %v219_v49  ;;  %v322_v59 = vadd.f32 %v321_v56, %v291_v51 }
  0x4f   : > { %v252_v60 = vadd.f32 %v251_v57, %v220_v53  ;;  %v323_v61 = vadd.f32 %v322_v59, %v292_v55 }
  0x51   : > { %v253_v62 = vrot.slane %v252_v60, 4  ;;  %v324_v63 = vadd.f32 %v323_v61, %v293_v58 }
  0x53   : > { %v254_v0 = vadd.f32 %v253_v62, %v252_v60  ;;  %v325_v1 = vrot.slane %v324_v63, 4 }
  0x55   : > { %v255_v2 = vrot.slane %v254_v0, 2  ;;  %v326_v3 = vadd.f32 %v325_v1, %v324_v63 }
  0x57   : > { %v256_v4 = vadd.f32 %v255_v2, %v254_v0  ;;  %v327_v5 = vrot.slane %v326_v3, 2 }
  0x59   : > { %v257_v6 = vrot.slane %v256_v4, 1  ;;  %v328_v8 = vadd.f32 %v327_v5, %v326_v3 }
  0x5b   : > { %v258_v9 = vadd.f32 %v257_v6, %v256_v4  ;;  %v329_v10 = vrot.slane %v328_v8, 1 }
  0x5d   : > { %v259_v11 = vadd.f32 %v258_v9, %v221_v7  ;;  %v330_v13 = vadd.f32 %v329_v10, %v328_v8  ;;  %336 = sbr.rel (%p393_p5) target bundleno = 132 (0x84), region = 40 }
  0x5f   : > { %260 = vst [vmem:[%s533_s3] sm:$0x1] %v259_v11  ;;  %v331_v14 = vadd.f32 %v330_v13, %v261_v12 }
  0x61   : > { %332 = vst [vmem:[%s534_s4] sm:$0x1] %v331_v14 }
  0x62   : > { %v343_v22 = vld [vmem:[%s531_s1] sm:$0x1] }
  0x63   : > { %v348_v25 = vld [vmem:[%s532_s2] sm:$0x1] }
  0x66   : > { %v337_v15 = vld [vmem:[%s533_s3] sm:$0x1] }
  0x67   : > { %v338_v17 = vmul.f32 0.001953125, %v337_v15 }
  0x68   : > { %v339_v16 = vld [vmem:[%s534_s4] sm:$0x1] }
  0x69   : > { %v340_v18 = vmul.f32 0.001953125, %v339_v16  ;;  %v341_v19 = vmul.f32 %v338_v17, %v338_v17 }
  0x6b   : > { %v342_v20 = vsub.f32 %v340_v18, %v341_v19 }
  0x6d   : > { %v344_v21 = vadd.f32 1e-05, %v342_v20 }
  0x6f   : > { %405 = vrsqrt.f32 %v344_v21 }
  0x7c   : > { %v406_v23 = vpop.eup %405 }
  0x7d   : > { %v346_v24 = vmul.f32 %v406_v23, %v343_v22 }
  0x7f   : > { %347 = vst [vmem:[%s533_s3] sm:$0x1] %v346_v24  ;;  %v349_v26 = vmul.f32 %v346_v24, %v338_v17 }
  0x81   : > { %v350_v27 = vsub.f32 %v348_v25, %v349_v26 }
  0x83   : > { %351 = vst [vmem:[%s534_s4] sm:$0x1] %v350_v27 }
  0x84 PF: > { %s15_s15 = sadd.s32 1, %s413_s15  }
  0x85   : > { %p12_p6 = scmp.ge.s32.totalorder %s15_s15, 4  }
  0x87   :  { %14 = sbr.rel (!%p12_p6) target bundleno = 1 (0x1), region = 74 }

// kernel: patch_merging_forward.3
= control target key start
LH: loop header
LB: loop body
LE: loop exit
PB: predicated region body
PF: predicated region fallthrough
CT: control target
= control target key end

     0   :  { %s855_s15 = smov 0   ;;  %s1101_s0 = inlined_call_operand.vmem [shape: f32[512,128], index: 0, kind: input, shape index: {}]   ;;  %s1102_s1 = inlined_call_operand.vmem [shape: f32[1,128], index: 1, kind: input, shape index: {}]   ;;  %s1103_s2 = inlined_call_operand.vmem [shape: f32[1,128], index: 2, kind: input, shape index: {}]   ;;  %s1104_s3 = inlined_call_operand.vmem [shape: f32[128,64], index: 3, kind: input, shape index: {}]   ;;  %s1105_s4 = inlined_call_operand.vmem [shape: f32[512,64], index: 4, kind: output, shape index: {}]  }
   0x1 LB: > { %s641_s16 = sadd.s32 4294967295, %s828_s15   ;;  %p645_p0 = scmp.ge.s32.totalorder %s828_s15, 1  ;;  %s828_s15 = sphi %s855_s15, %s14_s15  }
   0x2   : > { %p163_p1 = scmp.lt.s32.totalorder %s828_s15, 3 }
   0x4   : > { %p164_p2 = pnand %p645_p0, %p163_p1 }
   0x5   : > { %s646_s25 = sshll.u32 (!%p164_p2), %s641_s16, 5 }
   0x6   : > { %167 = sbr.rel (%p164_p2) target bundleno = 269 (0x10d), region = 36  ;;  %p190_p3 = scmp.lt.s32.totalorder (!%p164_p2), %s646_s25, 63 }
   0xb   : > { %v326_v0 = vld [vmem:[%s1104_s3 + $0x78] sm:$0xff]  ;;  %v325_v1 = vld [vmem:[%s1104_s3 + $0x70] sm:$0xff]  ;;  %v324_v2 = vld [vmem:[%s1104_s3 + $0x68] sm:$0xff]  ;;  %s1107_s25 = smov (!%p190_p3, %s646_s25), 63  ;;  %vm552_vm0 = vcmask 523264  }
   0xc   : > { %702 = vmatprep.subr.mxu0 %v326_v0  ;;  %782 = vmatprep.subr.mxu1 %v326_v0  ;;  %v323_v3 = vld [vmem:[%s1104_s3 + $0x60] sm:$0xff]  ;;  %v322_v4 = vld [vmem:[%s1104_s3 + $0x58] sm:$0xff]  ;;  %v321_v5 = vld [vmem:[%s1104_s3 + $0x50] sm:$0xff]  ;;  %s647_s10 = sshll.u32 %s1107_s25, 3 }
   0xd   : > { %703 = vmatpush3.msra.mxu0 %v326_v0  ;;  %798 = vmatpush3.msra.mxu1 %v326_v0  ;;  %v320_v6 = vld [vmem:[%s1104_s3 + $0x48] sm:$0xff]  ;;  %v319_v7 = vld [vmem:[%s1104_s3 + $0x40] sm:$0xff]  ;;  %v318_v8 = vld [vmem:[%s1104_s3 + $0x38] sm:$0xff]  ;;  %s904_s18 = scalar_lea.vmem %s1101_s0, %s647_s10  ;;  %s1032_s11 = scalar_lea.vmem %s1105_s4, %s647_s10 }
   0xe   : > { %704 = vmatprep.subr.mxu0 %v325_v1  ;;  %783 = vmatprep.subr.mxu1 %v325_v1  ;;  %v317_v9 = vld [vmem:[%s1104_s3 + $0x30] sm:$0xff]  ;;  %v316_v10 = vld [vmem:[%s1104_s3 + $0x28] sm:$0xff]  ;;  %v315_v11 = vld [vmem:[%s1104_s3 + $0x20] sm:$0xff] }
   0xf   : > { %705 = vmatpush3.msra.mxu0 %v325_v1  ;;  %799 = vmatpush3.msra.mxu1 %v325_v1  ;;  %v314_v12 = vld [vmem:[%s1104_s3 + $0x18] sm:$0xff]  ;;  %v201_v13 = vld [vmem:[%s904_s18] sm:$0xff]  ;;  %v202_v16 = vld [vmem:[%s904_s18 + $0x8] sm:$0xff] }
  0x10   : > { %706 = vmatprep.subr.mxu0 %v324_v2  ;;  %784 = vmatprep.subr.mxu1 %v324_v2  ;;  %v916_v14 = vld [vmem:[%s1102_s1] ss:$0 sm:$0xff]  ;;  %v218_v17 = vld [vmem:[%s904_s18 + $0x88] sm:$0xff]  ;;  %v313_v18 = vld [vmem:[%s1104_s3 + $0x10] sm:$0xff] }
  0x11   : > { %707 = vmatpush3.msra.mxu0 %v324_v2  ;;  %800 = vmatpush3.msra.mxu1 %v324_v2  ;;  %v217_v15 = vld [vmem:[%s904_s18 + $0x80] sm:$0xff]  ;;  %v240_v19 = vmul.f32 %v916_v14, %v201_v13  ;;  %v203_v20 = vld [vmem:[%s904_s18 + $0x10] sm:$0xff]  ;;  %v241_v24 = vmul.f32 %v916_v14, %v202_v16  ;;  %v257_v25 = vmul.f32 %v916_v14, %v218_v17  ;;  %v312_v26 = vld [vmem:[%s1104_s3 + $0x8] sm:$0xff] }
  0x12   : > { %708 = vmatprep.subr.mxu0 %v323_v3  ;;  %785 = vmatprep.subr.mxu1 %v323_v3  ;;  %v219_v21 = vld [vmem:[%s904_s18 + $0x90] sm:$0xff]  ;;  %v930_v22 = vld [vmem:[%s1103_s2] ss:$0 sm:$0xff]  ;;  %v256_v23 = vmul.f32 %v916_v14, %v217_v15  ;;  %v242_v27 = vmul.f32 %v916_v14, %v203_v20  ;;  %v204_v29 = vld [vmem:[%s904_s18 + $0x18] sm:$0xff] }
  0x13   : > { %709 = vmatpush3.msra.mxu0 %v323_v3  ;;  %801 = vmatpush3.msra.mxu1 %v323_v3  ;;  %v258_v28 = vmul.f32 %v916_v14, %v219_v21  ;;  %v220_v30 = vld [vmem:[%s904_s18 + $0x98] sm:$0xff]  ;;  %v205_v31 = vld [vmem:[%s904_s18 + $0x20] sm:$0xff]  ;;  %v279_v33 = vadd.f32 %v930_v22, %v240_v19  ;;  %v280_v36 = vadd.f32 %v930_v22, %v241_v24  ;;  %v206_v41 = vld [vmem:[%s904_s18 + $0x28] sm:$0xff] }
  0x14   : > { %710 = vmatprep.subr.mxu0 %v322_v4  ;;  %786 = vmatprep.subr.mxu1 %v322_v4  ;;  %v311_v32 = vld [vmem:[%s1104_s3] sm:$0xff]  ;;  %v295_v35 = vadd.f32 %v930_v22, %v256_v23  ;;  %v296_v37 = vadd.f32 %v930_v22, %v257_v25  ;;  %v243_v38 = vmul.f32 %v916_v14, %v204_v29  ;;  %v222_v42 = vld [vmem:[%s904_s18 + $0xa8] sm:$0xff]  ;;  %v207_v46 = vld [vmem:[%s904_s18 + $0x30] sm:$0xff] }
  0x15   : > { %711 = vmatpush3.msra.mxu0 %v322_v4  ;;  %802 = vmatpush3.msra.mxu1 %v322_v4  ;;  %v221_v34 = vld [vmem:[%s904_s18 + $0xa0] sm:$0xff]  ;;  %v259_v39 = vmul.f32 %v916_v14, %v220_v30  ;;  %v244_v40 = vmul.f32 %v916_v14, %v205_v31  ;;  %v281_v43 = vadd.f32 %v930_v22, %v242_v27  ;;  %v223_v47 = vld [vmem:[%s904_s18 + $0xb0] sm:$0xff]  ;;  %v208_v53 = vld [vmem:[%s904_s18 + $0x38] sm:$0xff] }
  0x16   : > { %712 = vmatprep.subr.mxu0 %v321_v5  ;;  %787 = vmatprep.subr.mxu1 %v321_v5  ;;  %v297_v44 = vadd.f32 %v930_v22, %v258_v28  ;;  %v260_v45 = vmul.f32 %v916_v14, %v221_v34  ;;  %v245_v48 = vmul.f32 %v916_v14, %v206_v41  ;;  %v224_v54 = vld [vmem:[%s904_s18 + $0xb8] sm:$0xff]  ;;  %v209_v58 = vld [vmem:[%s904_s18 + $0x40] sm:$0xff]  ;;  %v210_v4 = vld [vmem:[%s904_s18 + $0x48] sm:$0xff] }
  0x17   : > { %713 = vmatpush3.msra.mxu0 %v321_v5  ;;  %803 = vmatpush3.msra.mxu1 %v321_v5  ;;  %v261_v49 = vmul.f32 %v916_v14, %v222_v42  ;;  %v282_v50 = vadd.f32 %v930_v22, %v243_v38  ;;  %v298_v51 = vadd.f32 %v930_v22, %v259_v39  ;;  %v225_v59 = vld [vmem:[%s904_s18 + $0xc0] sm:$0xff]  ;;  %v226_v5 = vld [vmem:[%s904_s18 + $0xc8] sm:$0xff]  ;;  %v212_v13 = vld [vmem:[%s904_s18 + $0x58] sm:$0xff] }
  0x18   : > { %714 = vmatprep.subr.mxu0 %v320_v6  ;;  %788 = vmatprep.subr.mxu1 %v320_v6  ;;  %v283_v52 = vadd.f32 %v930_v22, %v244_v40  ;;  %v299_v55 = vadd.f32 %v930_v22, %v260_v45  ;;  %v246_v56 = vmul.f32 %v916_v14, %v207_v46  ;;  %v228_v15 = vld [vmem:[%s904_s18 + $0xd8] sm:$0xff]  ;;  %v213_v19 = vld [vmem:[%s904_s18 + $0x60] sm:$0xff]  ;;  %v214_v27 = vld [vmem:[%s904_s18 + $0x68] sm:$0xff] }
  0x19   : > { %715 = vmatpush3.msra.mxu0 %v320_v6  ;;  %804 = vmatpush3.msra.mxu1 %v320_v6  ;;  %v262_v57 = vmul.f32 %v916_v14, %v223_v47  ;;  %v247_v60 = vmul.f32 %v916_v14, %v208_v53  ;;  %v263_v61 = vmul.f32 %v916_v14, %v224_v54  ;;  %v211_v6 = vld [vmem:[%s904_s18 + $0x50] sm:$0xff]  ;;  %v229_v20 = vld [vmem:[%s904_s18 + $0xe0] sm:$0xff]  ;;  %v230_v31 = vld [vmem:[%s904_s18 + $0xe8] sm:$0xff] }
  0x1a   : > { %716 = vmatprep.subr.mxu0 %v319_v7  ;;  %789 = vmatprep.subr.mxu1 %v319_v7  ;;  %v284_v62 = vadd.f32 %v930_v22, %v245_v48  ;;  %v300_v63 = vadd.f32 %v930_v22, %v261_v49  ;;  %v248_v0 = vmul.f32 %v916_v14, %v209_v58  ;;  %v216_v42 = vld [vmem:[%s904_s18 + $0x78] sm:$0xff] }
  0x1b   : > { %717 = vmatpush3.msra.mxu0 %v319_v7  ;;  %805 = vmatpush3.msra.mxu1 %v319_v7  ;;  %v285_v1 = vadd.f32 %v930_v22, %v246_v56  ;;  %v301_v2 = vadd.f32 %v930_v22, %v262_v57  ;;  %v264_v3 = vmul.f32 %v916_v14, %v225_v59  ;;  %v227_v7 = vld [vmem:[%s904_s18 + $0xd0] sm:$0xff] }
  0x1c   : > { %718 = vmatprep.subr.mxu0 %v318_v8  ;;  %790 = vmatprep.subr.mxu1 %v318_v8  ;;  %v287_v16 = vadd.f32 %v930_v22, %v248_v0  ;;  %v251_v21 = vmul.f32 %v916_v14, %v212_v13  ;;  %v267_v23 = vmul.f32 %v916_v14, %v228_v15 }
  0x1d   : > { %719 = vmatpush3.msra.mxu0 %v318_v8  ;;  %806 = vmatpush3.msra.mxu1 %v318_v8  ;;  %v286_v8 = vadd.f32 %v930_v22, %v247_v60  ;;  %v303_v17 = vadd.f32 %v930_v22, %v264_v3  ;;  %v252_v29 = vmul.f32 %v916_v14, %v213_v19 }
  0x1e   : > { %720 = vmatprep.subr.mxu0 %v317_v9  ;;  %791 = vmatprep.subr.mxu1 %v317_v9  ;;  %v268_v30 = vmul.f32 %v916_v14, %v229_v20  ;;  %v290_v34 = vadd.f32 %v930_v22, %v251_v21  ;;  %v255_v46 = vmul.f32 %v916_v14, %v216_v42 }
  0x1f   : > { %721 = vmatpush3.msra.mxu0 %v317_v9  ;;  %807 = vmatpush3.msra.mxu1 %v317_v9  ;;  %v302_v9 = vadd.f32 %v930_v22, %v263_v61  ;;  %v291_v39 = vadd.f32 %v930_v22, %v252_v29 }
  0x20   : > { %722 = vmatprep.subr.mxu0 %v316_v10  ;;  %792 = vmatprep.subr.mxu1 %v316_v10  ;;  %v307_v40 = vadd.f32 %v930_v22, %v268_v30 }
  0x21   : > { %723 = vmatpush3.msra.mxu0 %v316_v10  ;;  %808 = vmatpush3.msra.mxu1 %v316_v10  ;;  %v249_v10 = vmul.f32 %v916_v14, %v210_v4 }
  0x22   : > { %724 = vmatprep.subr.mxu0 %v315_v11  ;;  %793 = vmatprep.subr.mxu1 %v315_v11 }
  0x23   : > { %725 = vmatpush3.msra.mxu0 %v315_v11  ;;  %809 = vmatpush3.msra.mxu1 %v315_v11  ;;  %v265_v11 = vmul.f32 %v916_v14, %v226_v5  ;;  %v288_v24 = vadd.f32 %v930_v22, %v249_v10 }
  0x24   : > { %726 = vmatprep.subr.mxu0 %v314_v12  ;;  %794 = vmatprep.subr.mxu1 %v314_v12 }
  0x25   : > { %727 = vmatpush3.msra.mxu0 %v314_v12  ;;  %810 = vmatpush3.msra.mxu1 %v314_v12  ;;  %v250_v12 = vmul.f32 %v916_v14, %v211_v6  ;;  %v304_v25 = vadd.f32 %v930_v22, %v265_v11 }
  0x26   : > { %728 = vmatprep.subr.mxu0 %v313_v18  ;;  %795 = vmatprep.subr.mxu1 %v313_v18 }
  0x27   : > { %729 = vmatpush3.msra.mxu0 %v313_v18  ;;  %811 = vmatpush3.msra.mxu1 %v313_v18  ;;  %v266_v18 = vmul.f32 %v916_v14, %v227_v7 }
  0x28   : > { %730 = vmatprep.subr.mxu0 %v312_v26  ;;  %796 = vmatprep.subr.mxu1 %v312_v26 }
  0x29   : > { %731 = vmatpush3.msra.mxu0 %v312_v26  ;;  %812 = vmatpush3.msra.mxu1 %v312_v26  ;;  %v289_v26 = vadd.f32 %v930_v22, %v250_v12  ;;  %v305_v28 = vadd.f32 %v930_v22, %v266_v18 }
  0x2a   : > { %732 = vmatprep.subr.mxu0 %v311_v32  ;;  %797 = vmatprep.subr.mxu1 %v311_v32 }
  0x2b   : > { %733 = vmatpush3.msra.mxu0 %v311_v32  ;;  %813 = vmatpush3.msra.mxu1 %v311_v32  ;;  %v215_v32 = vld [vmem:[%s904_s18 + $0x70] sm:$0xff] }
  0x2c   : > { %734 = vmatprep.mubr.f32.mxu0 %v279_v33  ;;  %758 = vmatprep.mubr.f32.mxu1 %v295_v35  ;;  %v231_v33 = vld [vmem:[%s904_s18 + $0xf0] sm:$0xff]  ;;  %v253_v35 = vmul.f32 %v916_v14, %v214_v27  ;;  %v254_v38 = vmul.f32 %v916_v14, %v215_v32 }
  0x2d   : > { %735 = vmatmul.mubr.f32.vlgmr.msra.gmra.mxu0 %v280_v36  ;;  %759 = vmatmul.mubr.f32.vlgmr.msra.gmra.mxu1 %v296_v37  ;;  %v306_v36 = vadd.f32 %v930_v22, %v267_v23  ;;  %v269_v37 = vmul.f32 %v916_v14, %v230_v31  ;;  %v270_v41 = vmul.f32 %v916_v14, %v231_v33 }
  0x2e   : > { %737 = vmatprep.mubr.f32.mxu0 %v281_v43  ;;  %761 = vmatprep.mubr.f32.mxu1 %v297_v44  ;;  %v232_v43 = vld [vmem:[%s904_s18 + $0xf8] sm:$0xff]  ;;  %v292_v44 = vadd.f32 %v930_v22, %v253_v35  ;;  %v293_v48 = vadd.f32 %v930_v22, %v254_v38 }
  0x2f   : > { %v308_v45 = vadd.f32 %v930_v22, %v269_v37  ;;  %v271_v47 = vmul.f32 %v916_v14, %v232_v43  ;;  %v309_v49 = vadd.f32 %v930_v22, %v270_v41 }
  0x31   : > { %738 = vmatmul.mubr.f32.gmra.mxu0 %v282_v50  ;;  %762 = vmatmul.mubr.f32.gmra.mxu1 %v298_v51  ;;  %v294_v50 = vadd.f32 %v930_v22, %v255_v46  ;;  %v310_v51 = vadd.f32 %v930_v22, %v271_v47 }
  0x32   : > { %740 = vmatprep.mubr.f32.mxu0 %v283_v52  ;;  %764 = vmatprep.mubr.f32.mxu1 %v299_v55 }
  0x35   : > { %741 = vmatmul.mubr.f32.gmra.mxu0 %v284_v62  ;;  %765 = vmatmul.mubr.f32.gmra.mxu1 %v300_v63 }
  0x36   : > { %743 = vmatprep.mubr.f32.mxu0 %v285_v1  ;;  %767 = vmatprep.mubr.f32.mxu1 %v301_v2 }
  0x39   : > { %744 = vmatmul.mubr.f32.gmra.mxu0 %v286_v8  ;;  %768 = vmatmul.mubr.f32.gmra.mxu1 %v302_v9 }
  0x3a   : > { %746 = vmatprep.mubr.f32.mxu0 %v287_v16  ;;  %770 = vmatprep.mubr.f32.mxu1 %v303_v17 }
  0x3d   : > { %747 = vmatmul.mubr.f32.gmra.mxu0 %v288_v24  ;;  %771 = vmatmul.mubr.f32.gmra.mxu1 %v304_v25 }
  0x3e   : > { %749 = vmatprep.mubr.f32.mxu0 %v289_v26  ;;  %773 = vmatprep.mubr.f32.mxu1 %v305_v28 }
  0x41   : > { %750 = vmatmul.mubr.f32.gmra.mxu0 %v290_v34  ;;  %774 = vmatmul.mubr.f32.gmra.mxu1 %v306_v36 }
  0x42   : > { %752 = vmatprep.mubr.f32.mxu0 %v291_v39  ;;  %776 = vmatprep.mubr.f32.mxu1 %v307_v40 }
  0x45   : > { %753 = vmatmul.mubr.f32.gmra.mxu0 %v292_v44  ;;  %777 = vmatmul.mubr.f32.gmra.mxu1 %v308_v45 }
  0x46   : > { %755 = vmatprep.mubr.f32.mxu0 %v293_v48  ;;  %779 = vmatprep.mubr.f32.mxu1 %v309_v49 }
  0x49   : > { %756 = vmatmul.mubr.f32.gmra.mxu0 %v294_v50  ;;  %780 = vmatmul.mubr.f32.gmra.mxu1 %v310_v51 }
  0xed   : > { %v736_v14 = vpop.f32.mrf.mxu0  ;;  %v760_v22 = vpop.f32.mrf.mxu1 }
  0xee   : > { %554 = vst.msk [vmem:[%s1032_s11 + $0x8] sm:$0xff] %vm552_vm0, %v736_v14  ;;  %570 = vst.msk [vmem:[%s1032_s11 + $0x88] sm:$0xff] %vm552_vm0, %v760_v22 }
  0xef   : > { %v393_v52 = vpop.f32.mrf.mxu0  ;;  %v473_v53 = vpop.f32.mrf.mxu1 }
  0xf0   : > { %553 = vst.msk [vmem:[%s1032_s11] sm:$0xff] %vm552_vm0, %v393_v52  ;;  %569 = vst.msk [vmem:[%s1032_s11 + $0x80] sm:$0xff] %vm552_vm0, %v473_v53 }
  0xf1   : > { %v739_v54 = vpop.f32.mrf.mxu0  ;;  %v763_v55 = vpop.f32.mrf.mxu1 }
  0xf2   : > { %556 = vst.msk [vmem:[%s1032_s11 + $0x18] sm:$0xff] %vm552_vm0, %v739_v54  ;;  %572 = vst.msk [vmem:[%s1032_s11 + $0x98] sm:$0xff] %vm552_vm0, %v763_v55 }
  0xf3   : > { %v403_v56 = vpop.f32.mrf.mxu0  ;;  %v483_v57 = vpop.f32.mrf.mxu1 }
  0xf4   : > { %555 = vst.msk [vmem:[%s1032_s11 + $0x10] sm:$0xff] %vm552_vm0, %v403_v56  ;;  %571 = vst.msk [vmem:[%s1032_s11 + $0x90] sm:$0xff] %vm552_vm0, %v483_v57 }
  0xf5   : > { %v742_v58 = vpop.f32.mrf.mxu0  ;;  %v766_v59 = vpop.f32.mrf.mxu1 }
  0xf6   : > { %558 = vst.msk [vmem:[%s1032_s11 + $0x28] sm:$0xff] %vm552_vm0, %v742_v58  ;;  %574 = vst.msk [vmem:[%s1032_s11 + $0xa8] sm:$0xff] %vm552_vm0, %v766_v59 }
  0xf7   : > { %v413_v60 = vpop.f32.mrf.mxu0  ;;  %v493_v61 = vpop.f32.mrf.mxu1 }
  0xf8   : > { %557 = vst.msk [vmem:[%s1032_s11 + $0x20] sm:$0xff] %vm552_vm0, %v413_v60  ;;  %573 = vst.msk [vmem:[%s1032_s11 + $0xa0] sm:$0xff] %vm552_vm0, %v493_v61 }
  0xf9   : > { %v745_v62 = vpop.f32.mrf.mxu0  ;;  %v769_v63 = vpop.f32.mrf.mxu1 }
  0xfa   : > { %560 = vst.msk [vmem:[%s1032_s11 + $0x38] sm:$0xff] %vm552_vm0, %v745_v62  ;;  %576 = vst.msk [vmem:[%s1032_s11 + $0xb8] sm:$0xff] %vm552_vm0, %v769_v63 }
  0xfb   : > { %v423_v0 = vpop.f32.mrf.mxu0  ;;  %v503_v1 = vpop.f32.mrf.mxu1 }
  0xfc   : > { %559 = vst.msk [vmem:[%s1032_s11 + $0x30] sm:$0xff] %vm552_vm0, %v423_v0  ;;  %575 = vst.msk [vmem:[%s1032_s11 + $0xb0] sm:$0xff] %vm552_vm0, %v503_v1 }
  0xfd   : > { %v748_v2 = vpop.f32.mrf.mxu0  ;;  %v772_v3 = vpop.f32.mrf.mxu1 }
  0xfe   : > { %562 = vst.msk [vmem:[%s1032_s11 + $0x48] sm:$0xff] %vm552_vm0, %v748_v2  ;;  %578 = vst.msk [vmem:[%s1032_s11 + $0xc8] sm:$0xff] %vm552_vm0, %v772_v3 }
  0xff   : > { %v433_v4 = vpop.f32.mrf.mxu0  ;;  %v513_v5 = vpop.f32.mrf.mxu1 }
 0x100   : > { %561 = vst.msk [vmem:[%s1032_s11 + $0x40] sm:$0xff] %vm552_vm0, %v433_v4  ;;  %577 = vst.msk [vmem:[%s1032_s11 + $0xc0] sm:$0xff] %vm552_vm0, %v513_v5 }
 0x101   : > { %v751_v6 = vpop.f32.mrf.mxu0  ;;  %v775_v7 = vpop.f32.mrf.mxu1 }
 0x102   : > { %564 = vst.msk [vmem:[%s1032_s11 + $0x58] sm:$0xff] %vm552_vm0, %v751_v6  ;;  %580 = vst.msk [vmem:[%s1032_s11 + $0xd8] sm:$0xff] %vm552_vm0, %v775_v7 }
 0x103   : > { %v443_v8 = vpop.f32.mrf.mxu0  ;;  %v523_v9 = vpop.f32.mrf.mxu1 }
 0x104   : > { %563 = vst.msk [vmem:[%s1032_s11 + $0x50] sm:$0xff] %vm552_vm0, %v443_v8  ;;  %579 = vst.msk [vmem:[%s1032_s11 + $0xd0] sm:$0xff] %vm552_vm0, %v523_v9 }
 0x105   : > { %v754_v10 = vpop.f32.mrf.mxu0  ;;  %v778_v11 = vpop.f32.mrf.mxu1 }
 0x106   : > { %566 = vst.msk [vmem:[%s1032_s11 + $0x68] sm:$0xff] %vm552_vm0, %v754_v10  ;;  %582 = vst.msk [vmem:[%s1032_s11 + $0xe8] sm:$0xff] %vm552_vm0, %v778_v11 }
 0x107   : > { %v453_v12 = vpop.f32.mrf.mxu0  ;;  %v533_v13 = vpop.f32.mrf.mxu1 }
 0x108   : > { %565 = vst.msk [vmem:[%s1032_s11 + $0x60] sm:$0xff] %vm552_vm0, %v453_v12  ;;  %581 = vst.msk [vmem:[%s1032_s11 + $0xe0] sm:$0xff] %vm552_vm0, %v533_v13 }
 0x109   : > { %v757_v15 = vpop.f32.mrf.mxu0  ;;  %v781_v16 = vpop.f32.mrf.mxu1 }
 0x10a   : > { %568 = vst.msk [vmem:[%s1032_s11 + $0x78] sm:$0xff] %vm552_vm0, %v757_v15  ;;  %584 = vst.msk [vmem:[%s1032_s11 + $0xf8] sm:$0xff] %vm552_vm0, %v781_v16 }
 0x10b   : > { %v463_v17 = vpop.f32.mrf.mxu0  ;;  %v543_v18 = vpop.f32.mrf.mxu1 }
 0x10c   : > { %567 = vst.msk [vmem:[%s1032_s11 + $0x70] sm:$0xff] %vm552_vm0, %v463_v17  ;;  %583 = vst.msk [vmem:[%s1032_s11 + $0xf0] sm:$0xff] %vm552_vm0, %v543_v18 }
 0x10d PF: > { %s14_s15 = sadd.s32 1, %s828_s15  }
 0x10e   : > { %p11_p4 = scmp.ge.s32.totalorder %s14_s15, 4  }
 0x110   :  { %13 = sbr.rel (!%p11_p4) target bundleno = 1 (0x1), region = 66 }

</bundles_post_ra>
